<compile_context>
chip_gen: v7x
topology: tpu7x:2x2x1
jax: 0.10.0
libtpu: 0.0.40
codegen_flags: <defaults>
</compile_context>

<pallas_src>
import functools

import jax
import jax.numpy as jnp
from jax import lax
from jax.experimental import pallas as pl
from jax.experimental.pallas import tpu as pltpu


# --------------------------------------------------------------------------
# helpers
# --------------------------------------------------------------------------
def _largest_divisor_at_most(n, cap):
    cap = max(1, min(n, cap))
    for d in range(cap, 0, -1):
        if n % d == 0:
            return d
    return 1


def _row_tile(M, target):
    """Row tile: full M if small, else a multiple-of-8 divisor of M (no partial tail)."""
    if M <= target:
        return M
    t = max(8, (target // 8) * 8)
    if M % 8 == 0:
        for d in range(t, 7, -8):
            if M % d == 0:
                return d
    # Fallback: padded tail block.  Correct because all row-tiled kernels are strictly
    # per-row (no cross-row reductions), so padding rows never leak into real rows.
    return t


def _col_tile(F, target):
    """FFN hidden-dim tile: a multiple-of-128 divisor of F (lane-dense), else full F."""
    if F <= 128:
        return F
    d = min(F, max(128, (target // 128) * 128))
    d = (d // 128) * 128
    while d >= 128:
        if F % d == 0:
            return d
        d -= 128
    return F


def _vmem_limit(nbytes):
    """Scoped-VMEM request: actual usage * 1.5 headroom, floored at the 32 MiB default."""
    return int(min(max(int(nbytes * 1.5), 32 * 1024 * 1024), 128 * 1024 * 1024))


def _ln_rows(z, gamma, beta, eps):
    """Per-row LayerNorm over the last dim, f32 math."""
    mean = jnp.mean(z, axis=-1, keepdims=True)
    c = z - mean
    var = jnp.mean(c * c, axis=-1, keepdims=True)
    return c * lax.rsqrt(var + eps) * gamma + beta


# --------------------------------------------------------------------------
# Pallas kernels
# --------------------------------------------------------------------------
def _attn_ln_kernel(x_ref, wqkv_ref, bqkv_ref, wo_ref, bo_ref, g_ref, b_ref,
                    o_ref, *, num_heads, head_dim, eps):
    """norm1(x + SelfAttention(x)) for one (Bt, S, E) batch block.

    Matmul operands are fed in the weights' dtype (bf16 fast path), accumulation is f32.
    Each head's output is folded directly into the out-projection accumulator, so there is
    no (Bt*S, E) scratch round-trip and no sub-128-lane masked stores.
    """
    Bt, S, E = x_ref.shape
    cdt = wqkv_ref.dtype                                    # compute dtype (bf16 or f32)

    # (Bt,S,E)->(Bt*S,E): free relayout when S % 8 == 0 (sublane-aligned collapse).
    x32 = x_ref[...].astype(jnp.float32).reshape(Bt * S, E)
    xc = x32.astype(cdt)

    # Single QKV projection: M = Bt*S rows feed the MXU at once.
    qkv = jnp.dot(xc, wqkv_ref[...], preferred_element_type=jnp.float32) + bqkv_ref[0]

    scale = head_dim ** -0.5
    acc = jnp.zeros((Bt * S, E), jnp.float32)
    # TODO(synk): for many heads / long S, replace this static unroll with grouped-head
    #             batched einsums and a KV-tiled online-softmax (flash) formulation.
    for h in range(num_heads):
        lo = h * head_dim
        # fold 1/sqrt(dh) into q (S*dh muls instead of S*S)
        qh = (qkv[:, lo:lo + head_dim] * scale).astype(cdt).reshape(Bt, S, head_dim)
        kh = qkv[:, E + lo:E + lo + head_dim].astype(cdt).reshape(Bt, S, head_dim)
        vh = qkv[:, 2 * E + lo:2 * E + lo + head_dim].astype(cdt).reshape(Bt, S, head_dim)

        s = jnp.einsum('bqd,bkd->bqk', qh, kh,
                       preferred_element_type=jnp.float32)          # (Bt, S, S) f32
        s = s - jnp.max(s, axis=-1, keepdims=True)
        p = jnp.exp(s)
        p = p * pl.reciprocal(jnp.sum(p, axis=-1, keepdims=True), approx=True)
        oh = jnp.einsum('bqk,bkd->bqd', p.astype(cdt), vh,
                        preferred_element_type=jnp.float32)          # (Bt, S, dh) f32
        # Fold this head's output straight into the out-projection accumulator.
        acc = acc + jnp.dot(oh.reshape(Bt * S, head_dim).astype(cdt),
                            wo_ref[lo:lo + head_dim, :],
                            preferred_element_type=jnp.float32)

    # fused residual + LayerNorm (norm1), f32 math
    z = x32 + acc + bo_ref[0]
    y = _ln_rows(z, g_ref[0], b_ref[0], eps)
    o_ref[...] = y.reshape(Bt, S, E).astype(o_ref.dtype)


def _ffn_ln_kernel(x_ref, w1_ref, b1_ref, w2_ref, b2_ref, g_ref, b_ref,
                   *rest, eps, final_ln):
    """norm2(x + linear2(relu(linear1(x)))) accumulated over hidden-dim (F) tiles.

    Grid is (row_tiles, F_tiles) with the F axis "arbitrary"; the second-matmul result is
    accumulated in an f32 VMEM scratch and residual+LN (and optionally the encoder's final
    LayerNorm) run on the last F step.
    """
    if final_ln:
        gf_ref, bf_ref, o_ref, acc_ref = rest
    else:
        o_ref, acc_ref = rest
        gf_ref = bf_ref = None

    f = pl.program_id(1)
    nf = pl.num_programs(1)
    cdt = w1_ref.dtype

    @pl.when(f == 0)
    def _():
        acc_ref[...] = jnp.zeros_like(acc_ref)

    xc = x_ref[...].astype(cdt)
    h = jnp.dot(xc, w1_ref[...], preferred_element_type=jnp.float32) + b1_ref[0]
    h = jnp.maximum(h, 0.0)                                          # ReLU (per F-tile ok)
    acc_ref[...] += jnp.dot(h.astype(cdt), w2_ref[...],
                            preferred_element_type=jnp.float32)

    @pl.when(f == nf - 1)
    def _():
        z = x_ref[...].astype(jnp.float32) + acc_ref[...] + b2_ref[0]
        y = _ln_rows(z, g_ref[0], b_ref[0], eps)
        if final_ln:                                                  # static flag
            y = _ln_rows(y, gf_ref[0], bf_ref[0], eps)
        o_ref[...] = y.astype(o_ref.dtype)


def _ln_kernel(x_ref, g_ref, b_ref, o_ref, *, eps):
    """Plain LayerNorm, row-tiled.  Only used when there are zero encoder layers."""
    o_ref[...] = _ln_rows(x_ref[...].astype(jnp.float32), g_ref[0], b_ref[0],
                          eps).astype(o_ref.dtype)


# --------------------------------------------------------------------------
# Wrappers
# --------------------------------------------------------------------------
def attn_add_ln(x, wqkv, bqkv, wo, bo, gamma, beta, *, num_heads, eps=1e-5,
                target_rows=512, compute_dtype=jnp.bfloat16):
    """norm1(x + SelfAttention(x)) in one pallas_call, grid over batch blocks."""
    B, S, E = x.shape
    assert E % num_heads == 0
    head_dim = E // num_heads

    # Pack batch elements per program for MXU M-dim fill, but keep >= 2 grid programs
    # whenever B >= 2 so v7x's two TensorCores both get work on the "parallel" axis.
    cap = max(1, target_rows // max(S, 1))
    if B >= 2:
        cap = min(cap, B // 2)
    bt = _largest_divisor_at_most(B, cap)
    grid = (B // bt,)

    wqkv_c = wqkv.astype(compute_dtype)
    wo_c = wo.astype(compute_dtype)
    wbytes = jnp.dtype(compute_dtype).itemsize
    abytes = jnp.dtype(x.dtype).itemsize

    rows = bt * S
    vmem = (2 * 2 * rows * E * abytes                 # x / out blocks, double-buffered
            + 2 * (3 * E * E + E * E) * wbytes        # wqkv + wo, double-buffered
            + rows * 3 * E * 4                        # qkv f32
            + 3 * rows * S * 4                        # scores / probs f32
            + 2 * rows * E * 4)                       # acc + LN temporaries
    flops = (2 * B * S * E * 3 * E                    # QKV proj
             + 4 * B * num_heads * S * S * head_dim   # scores + PV
             + 2 * B * S * E * E)                     # out proj
    bytes_accessed = (2 * B * S * E * abytes + 4 * E * E * wbytes + 10 * E * 4)

    kernel = functools.partial(_attn_ln_kernel, num_heads=num_heads,
                               head_dim=head_dim, eps=eps)
    return pl.pallas_call(
        kernel,
        out_shape=jax.ShapeDtypeStruct((B, S, E), x.dtype),
        grid=grid,
        in_specs=[
            pl.BlockSpec((bt, S, E), lambda i: (i, 0, 0)),
            pl.BlockSpec((E, 3 * E), lambda i: (0, 0)),
            pl.BlockSpec((1, 3 * E), lambda i: (0, 0)),
            pl.BlockSpec((E, E), lambda i: (0, 0)),
            pl.BlockSpec((1, E), lambda i: (0, 0)),
            pl.BlockSpec((1, E), lambda i: (0, 0)),
            pl.BlockSpec((1, E), lambda i: (0, 0)),
        ],
        out_specs=pl.BlockSpec((bt, S, E), lambda i: (i, 0, 0)),
        compiler_params=pltpu.CompilerParams(
            dimension_semantics=("parallel",),
            vmem_limit_bytes=_vmem_limit(vmem)),
        cost_estimate=pl.CostEstimate(flops=int(flops),
                                      transcendentals=int(B * num_heads * S * S),
                                      bytes_accessed=int(bytes_accessed)),
    )(x, wqkv_c, bqkv.reshape(1, -1).astype(jnp.float32), wo_c,
      bo.reshape(1, -1).astype(jnp.float32),
      gamma.reshape(1, -1).astype(jnp.float32),
      beta.reshape(1, -1).astype(jnp.float32))


def ffn_add_ln(x, w1, b1, w2, b2, gamma, beta, *, final_gamma=None, final_beta=None,
               eps=1e-5, tile_m=512, tile_f=1024, compute_dtype=jnp.bfloat16):
    """norm2(x + FFN(x)) (optionally followed by the encoder's final LayerNorm) in one
    pallas_call.  Grid: (row tiles ["parallel"], hidden-dim F tiles ["arbitrary"])."""
    B, S, E = x.shape
    F = w1.shape[1]
    M = B * S
    tm = _row_tile(M, tile_m)
    tf = _col_tile(F, tile_f)
    grid = (pl.cdiv(M, tm), F // tf)
    final_ln = final_gamma is not None

    w1c = w1.astype(compute_dtype)
    w2c = w2.astype(compute_dtype)
    wbytes = jnp.dtype(compute_dtype).itemsize
    abytes = jnp.dtype(x.dtype).itemsize

    vmem = (2 * 2 * tm * E * abytes                   # x / out blocks, double-buffered
            + 2 * 2 * E * tf * wbytes                 # w1 / w2 tiles, double-buffered
            + tm * E * 4 + tm * tf * 4                # acc scratch + hidden f32
            + 2 * (tf + 6 * E) * 4)                   # biases / LN params
    flops = 4 * M * E * F
    bytes_accessed = 2 * M * E * abytes + 2 * E * F * wbytes + (F + 7 * E) * 4

    args = [x.reshape(M, E), w1c, b1.reshape(1, -1), w2c, b2.reshape(1, -1),
            gamma.reshape(1, -1), beta.reshape(1, -1)]
    in_specs = [
        pl.BlockSpec((tm, E), lambda i, f: (i, 0)),
        pl.BlockSpec((E, tf), lambda i, f: (0, f)),
        pl.BlockSpec((1, tf), lambda i, f: (0, f)),
        pl.BlockSpec((tf, E), lambda i, f: (f, 0)),
        pl.BlockSpec((1, E), lambda i, f: (0, 0)),
        pl.BlockSpec((1, E), lambda i, f: (0, 0)),
        pl.BlockSpec((1, E), lambda i, f: (0, 0)),
    ]
    if final_ln:
        args += [final_gamma.reshape(1, -1), final_beta.reshape(1, -1)]
        in_specs += [pl.BlockSpec((1, E), lambda i, f: (0, 0)),
                     pl.BlockSpec((1, E), lambda i, f: (0, 0))]

    out = pl.pallas_call(
        functools.partial(_ffn_ln_kernel, eps=eps, final_ln=final_ln),
        out_shape=jax.ShapeDtypeStruct((M, E), x.dtype),
        grid=grid,
        in_specs=in_specs,
        out_specs=pl.BlockSpec((tm, E), lambda i, f: (i, 0)),
        scratch_shapes=[pltpu.VMEM((tm, E), jnp.float32)],
        compiler_params=pltpu.CompilerParams(
            dimension_semantics=("parallel", "arbitrary"),
            vmem_limit_bytes=_vmem_limit(vmem)),
        cost_estimate=pl.CostEstimate(flops=int(flops), transcendentals=0,
                                      bytes_accessed=int(bytes_accessed)),
    )(*args)
    return out.reshape(B, S, E)


def layernorm(x, gamma, beta, *, eps=1e-5, tile_m=1024):
    """Standalone final LayerNorm (used only when there are no encoder layers)."""
    B, S, E = x.shape
    M = B * S
    tm = _row_tile(M, tile_m)
    grid = (pl.cdiv(M, tm),)
    out = pl.pallas_call(
        functools.partial(_ln_kernel, eps=eps),
        out_shape=jax.ShapeDtypeStruct((M, E), x.dtype),
        grid=grid,
        in_specs=[pl.BlockSpec((tm, E), lambda i: (i, 0)),
                  pl.BlockSpec((1, E), lambda i: (0, 0)),
                  pl.BlockSpec((1, E), lambda i: (0, 0))],
        out_specs=pl.BlockSpec((tm, E), lambda i: (i, 0)),
        compiler_params=pltpu.CompilerParams(dimension_semantics=("parallel",)),
        cost_estimate=pl.CostEstimate(flops=int(10 * M * E), transcendentals=0,
                                      bytes_accessed=int(4 * (2 * M * E + 2 * E))),
    )(x.reshape(M, E), gamma.reshape(1, -1), beta.reshape(1, -1))
    return out.reshape(B, S, E)


def transformer_temporal_encoder(x, params, *, num_heads, compute_dtype=jnp.bfloat16,
                                 target_rows=512, tile_m=512, tile_f=1024):
    """Matches TransformerTemporalEncoder.forward in eval mode (dropout = identity).

    post-norm TransformerEncoderLayer: x = norm1(x + SA(x)); x = norm2(x + FF(x));
    the final self.norm is fused into the last layer's FFN kernel.
    """
    layers = params["layers"]
    if not layers:
        return layernorm(x, params["lnf_g"], params["lnf_b"])
    for li, layer in enumerate(layers):
        last = li == len(layers) - 1
        x = attn_add_ln(x, layer["wqkv"], layer["bqkv"], layer["wo"], layer["bo"],
                        layer["ln1_g"], layer["ln1_b"], num_heads=num_heads,
                        target_rows=target_rows, compute_dtype=compute_dtype)
        x = ffn_add_ln(x, layer["w1"], layer["b1"], layer["w2"], layer["b2"],
                       layer["ln2_g"], layer["ln2_b"],
                       final_gamma=params["lnf_g"] if last else None,
                       final_beta=params["lnf_b"] if last else None,
                       tile_m=tile_m, tile_f=tile_f, compute_dtype=compute_dtype)
    return x


# --------------------------------------------------------------------------
# Deterministic parameter init (synthetic; shapes from nn.TransformerEncoderLayer)
# --------------------------------------------------------------------------
def init_params(key, embed_dim, num_layers):
    E = embed_dim
    F = 4 * E
    layers = []
    for _ in range(num_layers):
        key, *ks = jax.random.split(key, 9)
        layers.append(dict(
            wqkv=jax.random.normal(ks[0], (E, 3 * E), jnp.float32) * (E ** -0.5),
            bqkv=jax.random.normal(ks[1], (3 * E,), jnp.float32) * 0.02,
            wo=jax.random.normal(ks[2], (E, E), jnp.float32) * (E ** -0.5),
            bo=jax.random.normal(ks[3], (E,), jnp.float32) * 0.02,
            w1=jax.random.normal(ks[4], (E, F), jnp.float32) * (E ** -0.5),
            b1=jax.random.normal(ks[5], (F,), jnp.float32) * 0.02,
            w2=jax.random.normal(ks[6], (F, E), jnp.float32) * (F ** -0.5),
            b2=jax.random.normal(ks[7], (E,), jnp.float32) * 0.02,
            ln1_g=jnp.ones((E,), jnp.float32), ln1_b=jnp.zeros((E,), jnp.float32),
            ln2_g=jnp.ones((E,), jnp.float32), ln2_b=jnp.zeros((E,), jnp.float32),
        ))
    return dict(layers=layers,
                lnf_g=jnp.ones((E,), jnp.float32),
                lnf_b=jnp.zeros((E,), jnp.float32))


# --------------------------------------------------------------------------
# Pure-JAX reference (numerical sanity check)
# --------------------------------------------------------------------------
def reference(x, params, *, num_heads):
    def ln(z, g, b, eps=1e-5):
        m = z.mean(-1, keepdims=True)
        v = ((z - m) ** 2).mean(-1, keepdims=True)
        return (z - m) / jnp.sqrt(v + eps) * g + b

    B, S, E = x.shape
    H, dh = num_heads, E // num_heads
    for layer in params["layers"]:
        qkv = x @ layer["wqkv"] + layer["bqkv"]
        q, k, v = jnp.split(qkv, 3, axis=-1)
        q = q.reshape(B, S, H, dh).transpose(0, 2, 1, 3)
        k = k.reshape(B, S, H, dh).transpose(0, 2, 1, 3)
        v = v.reshape(B, S, H, dh).transpose(0, 2, 1, 3)
        s = jnp.einsum("bhqd,bhkd->bhqk", q, k) / (dh ** 0.5)
        p = jax.nn.softmax(s, axis=-1)
        o = jnp.einsum("bhqk,bhkd->bhqd", p, v).transpose(0, 2, 1, 3).reshape(B, S, E)
        sa = o @ layer["wo"] + layer["bo"]
        x = ln(x + sa, layer["ln1_g"], layer["ln1_b"])
        h = jnp.maximum(x @ layer["w1"] + layer["b1"], 0.0)
        ff = h @ layer["w2"] + layer["b2"]
        x = ln(x + ff, layer["ln2_g"], layer["ln2_b"])
    return ln(x, params["lnf_g"], params["lnf_b"])


# --------------------------------------------------------------------------
if __name__ == "__main__":
    B, S, E = 2, 8, 32          # batch, sequence, embed_dim
    NUM_HEADS, NUM_LAYERS = 4, 2

    key = jax.random.PRNGKey(0)
    kx, kp = jax.random.split(key)
    x = jax.random.normal(kx, (B, S, E), jnp.float32)
    params = init_params(kp, E, NUM_LAYERS)

    # bf16 fast path (default) and f32 exact path
    out_bf16 = jax.block_until_ready(
        transformer_temporal_encoder(x, params, num_heads=NUM_HEADS))
    out_f32 = jax.block_until_ready(
        transformer_temporal_encoder(x, params, num_heads=NUM_HEADS,
                                     compute_dtype=jnp.float32))

    with jax.default_matmul_precision("highest"):
        ref = jax.block_until_ready(reference(x, params, num_heads=NUM_HEADS))

    assert out_bf16.shape == (B, S, E) and out_bf16.dtype == jnp.float32
    assert out_f32.shape == (B, S, E) and out_f32.dtype == jnp.float32
    # f32 compute path: tight tolerance (pl.reciprocal approx contributes ~1e-3 rel).
    assert jnp.allclose(out_f32, ref, atol=1e-2, rtol=1e-2), "f32-path mismatch vs reference"
    # bf16 operand path: looser tolerance for bf16 rounding of matmul operands.
    assert jnp.allclose(out_bf16, ref, atol=5e-2, rtol=5e-2), "bf16-path mismatch vs reference"

    print("KERNEL_OK")
</pallas_src>

<mosaic_0001>
module attributes {stable_mosaic.version = 11 : i64} {
  func.func @_attn_ln_kernel(%arg0: i32, %arg1: memref<1x8x32xf32, #tpu.memory_space<vmem>>, %arg2: memref<32x96xbf16, #tpu.memory_space<vmem>>, %arg3: memref<1x96xf32, #tpu.memory_space<vmem>>, %arg4: memref<32x32xbf16, #tpu.memory_space<vmem>>, %arg5: memref<1x32xf32, #tpu.memory_space<vmem>>, %arg6: memref<1x32xf32, #tpu.memory_space<vmem>>, %arg7: memref<1x32xf32, #tpu.memory_space<vmem>>, %arg8: memref<1x8x32xf32, #tpu.memory_space<vmem>>) attributes {dimension_semantics = [#tpu.dimension_semantics<parallel>], iteration_bounds = array<i64: 2>, scalar_prefetch = 0 : i64, scratch_operands = 0 : i64, tpu.core_type = #tpu.core_type<tc>, window_params = [{transform_indices = @transform_0, window_bounds = array<i64: 1, 8, 32>}, {pipeline_mode = #tpu.pipeline_mode<synchronous>, transform_indices = @transform_1, window_bounds = array<i64: 32, 96>}, {pipeline_mode = #tpu.pipeline_mode<synchronous>, transform_indices = @transform_2, window_bounds = array<i64: 1, 96>}, {pipeline_mode = #tpu.pipeline_mode<synchronous>, transform_indices = @transform_3, window_bounds = array<i64: 32, 32>}, {pipeline_mode = #tpu.pipeline_mode<synchronous>, transform_indices = @transform_4, window_bounds = array<i64: 1, 32>}, {pipeline_mode = #tpu.pipeline_mode<synchronous>, transform_indices = @transform_5, window_bounds = array<i64: 1, 32>}, {pipeline_mode = #tpu.pipeline_mode<synchronous>, transform_indices = @transform_6, window_bounds = array<i64: 1, 32>}, {transform_indices = @transform_7, window_bounds = array<i64: 1, 8, 32>}]} {
    %c0 = arith.constant 0 : index
    %c0_0 = arith.constant 0 : index
    %c0_1 = arith.constant 0 : index
    %0 = vector.load %arg1[%c0, %c0_0, %c0_1] : memref<1x8x32xf32, #tpu.memory_space<vmem>>, vector<1x8x32xf32>
    %1 = vector.shape_cast %0 : vector<1x8x32xf32> to vector<8x32xf32>
    %2 = arith.truncf %1 : vector<8x32xf32> to vector<8x32xbf16>
    %c0_2 = arith.constant 0 : index
    %c0_3 = arith.constant 0 : index
    %3 = vector.load %arg2[%c0_2, %c0_3] : memref<32x96xbf16, #tpu.memory_space<vmem>>, vector<32x96xbf16>
    %cst = arith.constant dense<0.000000e+00> : vector<8x96xf32>
    %4 = tpu.matmul %2, %3, %cst {dimension_numbers = #tpu.dot_dimension_numbers<[1], [0], [0], [1], [0, 0, 1, 1], [], []>} : vector<8x32xbf16>, vector<32x96xbf16>, vector<8x96xf32> -> vector<8x96xf32>
    %c0_4 = arith.constant 0 : index
    %c0_5 = arith.constant 0 : index
    %5 = vector.load %arg3[%c0_4, %c0_5] : memref<1x96xf32, #tpu.memory_space<vmem>>, vector<1x96xf32>
    %6 = vector.shape_cast %5 : vector<1x96xf32> to vector<96xf32>
    %7 = vector.shape_cast %6 : vector<96xf32> to vector<1x96xf32>
    %8 = vector.broadcast %7 : vector<1x96xf32> to vector<8x96xf32>
    %9 = arith.addf %4, %8 : vector<8x96xf32>
    %cst_6 = arith.constant 0.000000e+00 : f32
    %10 = vector.broadcast %cst_6 : f32 to vector<8x32xf32>
    %11 = vector.extract_strided_slice %9 {offsets = [0, 0], sizes = [8, 8], strides = [1, 1]} : vector<8x96xf32> to vector<8x8xf32>
    %cst_7 = arith.constant 0.353553385 : f32
    %12 = vector.broadcast %cst_7 : f32 to vector<8x8xf32>
    %13 = arith.mulf %11, %12 : vector<8x8xf32>
    %14 = arith.truncf %13 : vector<8x8xf32> to vector<8x8xbf16>
    %15 = vector.shape_cast %14 : vector<8x8xbf16> to vector<1x8x8xbf16>
    %16 = vector.extract_strided_slice %9 {offsets = [0, 32], sizes = [8, 8], strides = [1, 1]} : vector<8x96xf32> to vector<8x8xf32>
    %17 = arith.truncf %16 : vector<8x8xf32> to vector<8x8xbf16>
    %18 = vector.shape_cast %17 : vector<8x8xbf16> to vector<1x8x8xbf16>
    %19 = vector.extract_strided_slice %9 {offsets = [0, 64], sizes = [8, 8], strides = [1, 1]} : vector<8x96xf32> to vector<8x8xf32>
    %20 = arith.truncf %19 : vector<8x8xf32> to vector<8x8xbf16>
    %21 = vector.shape_cast %20 : vector<8x8xbf16> to vector<1x8x8xbf16>
    "tpu.trace_start"() <{level = 10 : i32, message = "bqd,bkd->bqk"}> : () -> ()
    %cst_8 = arith.constant dense<0.000000e+00> : vector<1x8x8xf32>
    %22 = tpu.matmul %15, %18, %cst_8 {dimension_numbers = #tpu.dot_dimension_numbers<[2], [2], [1], [1], [0, 0, 0, 1, 1, 1], [0], [0]>} : vector<1x8x8xbf16>, vector<1x8x8xbf16>, vector<1x8x8xf32> -> vector<1x8x8xf32>
    "tpu.trace_stop"() : () -> ()
    %cst_9 = arith.constant dense<0xFF800000> : vector<1x8xf32>
    %23 = vector.multi_reduction <maximumf>, %22, %cst_9 [2] : vector<1x8x8xf32> to vector<1x8xf32>
    %24 = vector.shape_cast %23 : vector<1x8xf32> to vector<1x8x1xf32>
    %25 = vector.broadcast %24 : vector<1x8x1xf32> to vector<1x8x8xf32>
    %26 = arith.subf %22, %25 : vector<1x8x8xf32>
    %27 = math.exp %26 : vector<1x8x8xf32>
    %cst_10 = arith.constant dense<0.000000e+00> : vector<1x8xf32>
    %28 = vector.multi_reduction <add>, %27, %cst_10 [2] : vector<1x8x8xf32> to vector<1x8xf32>
    %29 = vector.shape_cast %28 : vector<1x8xf32> to vector<1x8x1xf32>
    %30 = tpu.reciprocal %29 {approx = true} : vector<1x8x1xf32> -> vector<1x8x1xf32>
    %31 = vector.broadcast %30 : vector<1x8x1xf32> to vector<1x8x8xf32>
    %32 = arith.mulf %27, %31 : vector<1x8x8xf32>
    %33 = arith.truncf %32 : vector<1x8x8xf32> to vector<1x8x8xbf16>
    "tpu.trace_start"() <{level = 10 : i32, message = "bqk,bkd->bqd"}> : () -> ()
    %cst_11 = arith.constant dense<0.000000e+00> : vector<1x8x8xf32>
    %34 = tpu.matmul %33, %21, %cst_11 {dimension_numbers = #tpu.dot_dimension_numbers<[2], [1], [1], [2], [0, 0, 0, 1, 1, 2], [0], [0]>} : vector<1x8x8xbf16>, vector<1x8x8xbf16>, vector<1x8x8xf32> -> vector<1x8x8xf32>
    "tpu.trace_stop"() : () -> ()
    %35 = vector.shape_cast %34 : vector<1x8x8xf32> to vector<8x8xf32>
    %36 = arith.truncf %35 : vector<8x8xf32> to vector<8x8xbf16>
    %c0_12 = arith.constant 0 : index
    %c0_13 = arith.constant 0 : index
    %37 = vector.load %arg4[%c0_12, %c0_13] : memref<32x32xbf16, #tpu.memory_space<vmem>>, vector<8x32xbf16>
    %cst_14 = arith.constant dense<0.000000e+00> : vector<8x32xf32>
    %38 = tpu.matmul %36, %37, %cst_14 {dimension_numbers = #tpu.dot_dimension_numbers<[1], [0], [0], [1], [0, 0, 1, 1], [], []>} : vector<8x8xbf16>, vector<8x32xbf16>, vector<8x32xf32> -> vector<8x32xf32>
    %39 = arith.addf %10, %38 : vector<8x32xf32>
    %40 = vector.extract_strided_slice %9 {offsets = [0, 8], sizes = [8, 8], strides = [1, 1]} : vector<8x96xf32> to vector<8x8xf32>
    %cst_15 = arith.constant 0.353553385 : f32
    %41 = vector.broadcast %cst_15 : f32 to vector<8x8xf32>
    %42 = arith.mulf %40, %41 : vector<8x8xf32>
    %43 = arith.truncf %42 : vector<8x8xf32> to vector<8x8xbf16>
    %44 = vector.shape_cast %43 : vector<8x8xbf16> to vector<1x8x8xbf16>
    %45 = vector.extract_strided_slice %9 {offsets = [0, 40], sizes = [8, 8], strides = [1, 1]} : vector<8x96xf32> to vector<8x8xf32>
    %46 = arith.truncf %45 : vector<8x8xf32> to vector<8x8xbf16>
    %47 = vector.shape_cast %46 : vector<8x8xbf16> to vector<1x8x8xbf16>
    %48 = vector.extract_strided_slice %9 {offsets = [0, 72], sizes = [8, 8], strides = [1, 1]} : vector<8x96xf32> to vector<8x8xf32>
    %49 = arith.truncf %48 : vector<8x8xf32> to vector<8x8xbf16>
    %50 = vector.shape_cast %49 : vector<8x8xbf16> to vector<1x8x8xbf16>
    "tpu.trace_start"() <{level = 10 : i32, message = "bqd,bkd->bqk"}> : () -> ()
    %cst_16 = arith.constant dense<0.000000e+00> : vector<1x8x8xf32>
    %51 = tpu.matmul %44, %47, %cst_16 {dimension_numbers = #tpu.dot_dimension_numbers<[2], [2], [1], [1], [0, 0, 0, 1, 1, 1], [0], [0]>} : vector<1x8x8xbf16>, vector<1x8x8xbf16>, vector<1x8x8xf32> -> vector<1x8x8xf32>
    "tpu.trace_stop"() : () -> ()
    %cst_17 = arith.constant dense<0xFF800000> : vector<1x8xf32>
    %52 = vector.multi_reduction <maximumf>, %51, %cst_17 [2] : vector<1x8x8xf32> to vector<1x8xf32>
    %53 = vector.shape_cast %52 : vector<1x8xf32> to vector<1x8x1xf32>
    %54 = vector.broadcast %53 : vector<1x8x1xf32> to vector<1x8x8xf32>
    %55 = arith.subf %51, %54 : vector<1x8x8xf32>
    %56 = math.exp %55 : vector<1x8x8xf32>
    %cst_18 = arith.constant dense<0.000000e+00> : vector<1x8xf32>
    %57 = vector.multi_reduction <add>, %56, %cst_18 [2] : vector<1x8x8xf32> to vector<1x8xf32>
    %58 = vector.shape_cast %57 : vector<1x8xf32> to vector<1x8x1xf32>
    %59 = tpu.reciprocal %58 {approx = true} : vector<1x8x1xf32> -> vector<1x8x1xf32>
    %60 = vector.broadcast %59 : vector<1x8x1xf32> to vector<1x8x8xf32>
    %61 = arith.mulf %56, %60 : vector<1x8x8xf32>
    %62 = arith.truncf %61 : vector<1x8x8xf32> to vector<1x8x8xbf16>
    "tpu.trace_start"() <{level = 10 : i32, message = "bqk,bkd->bqd"}> : () -> ()
    %cst_19 = arith.constant dense<0.000000e+00> : vector<1x8x8xf32>
    %63 = tpu.matmul %62, %50, %cst_19 {dimension_numbers = #tpu.dot_dimension_numbers<[2], [1], [1], [2], [0, 0, 0, 1, 1, 2], [0], [0]>} : vector<1x8x8xbf16>, vector<1x8x8xbf16>, vector<1x8x8xf32> -> vector<1x8x8xf32>
    "tpu.trace_stop"() : () -> ()
    %64 = vector.shape_cast %63 : vector<1x8x8xf32> to vector<8x8xf32>
    %65 = arith.truncf %64 : vector<8x8xf32> to vector<8x8xbf16>
    %c8 = arith.constant 8 : index
    %c0_20 = arith.constant 0 : index
    %66 = vector.load %arg4[%c8, %c0_20] : memref<32x32xbf16, #tpu.memory_space<vmem>>, vector<8x32xbf16>
    %cst_21 = arith.constant dense<0.000000e+00> : vector<8x32xf32>
    %67 = tpu.matmul %65, %66, %cst_21 {dimension_numbers = #tpu.dot_dimension_numbers<[1], [0], [0], [1], [0, 0, 1, 1], [], []>} : vector<8x8xbf16>, vector<8x32xbf16>, vector<8x32xf32> -> vector<8x32xf32>
    %68 = arith.addf %39, %67 : vector<8x32xf32>
    %69 = vector.extract_strided_slice %9 {offsets = [0, 16], sizes = [8, 8], strides = [1, 1]} : vector<8x96xf32> to vector<8x8xf32>
    %cst_22 = arith.constant 0.353553385 : f32
    %70 = vector.broadcast %cst_22 : f32 to vector<8x8xf32>
    %71 = arith.mulf %69, %70 : vector<8x8xf32>
    %72 = arith.truncf %71 : vector<8x8xf32> to vector<8x8xbf16>
    %73 = vector.shape_cast %72 : vector<8x8xbf16> to vector<1x8x8xbf16>
    %74 = vector.extract_strided_slice %9 {offsets = [0, 48], sizes = [8, 8], strides = [1, 1]} : vector<8x96xf32> to vector<8x8xf32>
    %75 = arith.truncf %74 : vector<8x8xf32> to vector<8x8xbf16>
    %76 = vector.shape_cast %75 : vector<8x8xbf16> to vector<1x8x8xbf16>
    %77 = vector.extract_strided_slice %9 {offsets = [0, 80], sizes = [8, 8], strides = [1, 1]} : vector<8x96xf32> to vector<8x8xf32>
    %78 = arith.truncf %77 : vector<8x8xf32> to vector<8x8xbf16>
    %79 = vector.shape_cast %78 : vector<8x8xbf16> to vector<1x8x8xbf16>
    "tpu.trace_start"() <{level = 10 : i32, message = "bqd,bkd->bqk"}> : () -> ()
    %cst_23 = arith.constant dense<0.000000e+00> : vector<1x8x8xf32>
    %80 = tpu.matmul %73, %76, %cst_23 {dimension_numbers = #tpu.dot_dimension_numbers<[2], [2], [1], [1], [0, 0, 0, 1, 1, 1], [0], [0]>} : vector<1x8x8xbf16>, vector<1x8x8xbf16>, vector<1x8x8xf32> -> vector<1x8x8xf32>
    "tpu.trace_stop"() : () -> ()
    %cst_24 = arith.constant dense<0xFF800000> : vector<1x8xf32>
    %81 = vector.multi_reduction <maximumf>, %80, %cst_24 [2] : vector<1x8x8xf32> to vector<1x8xf32>
    %82 = vector.shape_cast %81 : vector<1x8xf32> to vector<1x8x1xf32>
    %83 = vector.broadcast %82 : vector<1x8x1xf32> to vector<1x8x8xf32>
    %84 = arith.subf %80, %83 : vector<1x8x8xf32>
    %85 = math.exp %84 : vector<1x8x8xf32>
    %cst_25 = arith.constant dense<0.000000e+00> : vector<1x8xf32>
    %86 = vector.multi_reduction <add>, %85, %cst_25 [2] : vector<1x8x8xf32> to vector<1x8xf32>
    %87 = vector.shape_cast %86 : vector<1x8xf32> to vector<1x8x1xf32>
    %88 = tpu.reciprocal %87 {approx = true} : vector<1x8x1xf32> -> vector<1x8x1xf32>
    %89 = vector.broadcast %88 : vector<1x8x1xf32> to vector<1x8x8xf32>
    %90 = arith.mulf %85, %89 : vector<1x8x8xf32>
    %91 = arith.truncf %90 : vector<1x8x8xf32> to vector<1x8x8xbf16>
    "tpu.trace_start"() <{level = 10 : i32, message = "bqk,bkd->bqd"}> : () -> ()
    %cst_26 = arith.constant dense<0.000000e+00> : vector<1x8x8xf32>
    %92 = tpu.matmul %91, %79, %cst_26 {dimension_numbers = #tpu.dot_dimension_numbers<[2], [1], [1], [2], [0, 0, 0, 1, 1, 2], [0], [0]>} : vector<1x8x8xbf16>, vector<1x8x8xbf16>, vector<1x8x8xf32> -> vector<1x8x8xf32>
    "tpu.trace_stop"() : () -> ()
    %93 = vector.shape_cast %92 : vector<1x8x8xf32> to vector<8x8xf32>
    %94 = arith.truncf %93 : vector<8x8xf32> to vector<8x8xbf16>
    %c16 = arith.constant 16 : index
    %c0_27 = arith.constant 0 : index
    %95 = vector.load %arg4[%c16, %c0_27] : memref<32x32xbf16, #tpu.memory_space<vmem>>, vector<8x32xbf16>
    %cst_28 = arith.constant dense<0.000000e+00> : vector<8x32xf32>
    %96 = tpu.matmul %94, %95, %cst_28 {dimension_numbers = #tpu.dot_dimension_numbers<[1], [0], [0], [1], [0, 0, 1, 1], [], []>} : vector<8x8xbf16>, vector<8x32xbf16>, vector<8x32xf32> -> vector<8x32xf32>
    %97 = arith.addf %68, %96 : vector<8x32xf32>
    %98 = vector.extract_strided_slice %9 {offsets = [0, 24], sizes = [8, 8], strides = [1, 1]} : vector<8x96xf32> to vector<8x8xf32>
    %cst_29 = arith.constant 0.353553385 : f32
    %99 = vector.broadcast %cst_29 : f32 to vector<8x8xf32>
    %100 = arith.mulf %98, %99 : vector<8x8xf32>
    %101 = arith.truncf %100 : vector<8x8xf32> to vector<8x8xbf16>
    %102 = vector.shape_cast %101 : vector<8x8xbf16> to vector<1x8x8xbf16>
    %103 = vector.extract_strided_slice %9 {offsets = [0, 56], sizes = [8, 8], strides = [1, 1]} : vector<8x96xf32> to vector<8x8xf32>
    %104 = arith.truncf %103 : vector<8x8xf32> to vector<8x8xbf16>
    %105 = vector.shape_cast %104 : vector<8x8xbf16> to vector<1x8x8xbf16>
    %106 = vector.extract_strided_slice %9 {offsets = [0, 88], sizes = [8, 8], strides = [1, 1]} : vector<8x96xf32> to vector<8x8xf32>
    %107 = arith.truncf %106 : vector<8x8xf32> to vector<8x8xbf16>
    %108 = vector.shape_cast %107 : vector<8x8xbf16> to vector<1x8x8xbf16>
    "tpu.trace_start"() <{level = 10 : i32, message = "bqd,bkd->bqk"}> : () -> ()
    %cst_30 = arith.constant dense<0.000000e+00> : vector<1x8x8xf32>
    %109 = tpu.matmul %102, %105, %cst_30 {dimension_numbers = #tpu.dot_dimension_numbers<[2], [2], [1], [1], [0, 0, 0, 1, 1, 1], [0], [0]>} : vector<1x8x8xbf16>, vector<1x8x8xbf16>, vector<1x8x8xf32> -> vector<1x8x8xf32>
    "tpu.trace_stop"() : () -> ()
    %cst_31 = arith.constant dense<0xFF800000> : vector<1x8xf32>
    %110 = vector.multi_reduction <maximumf>, %109, %cst_31 [2] : vector<1x8x8xf32> to vector<1x8xf32>
    %111 = vector.shape_cast %110 : vector<1x8xf32> to vector<1x8x1xf32>
    %112 = vector.broadcast %111 : vector<1x8x1xf32> to vector<1x8x8xf32>
    %113 = arith.subf %109, %112 : vector<1x8x8xf32>
    %114 = math.exp %113 : vector<1x8x8xf32>
    %cst_32 = arith.constant dense<0.000000e+00> : vector<1x8xf32>
    %115 = vector.multi_reduction <add>, %114, %cst_32 [2] : vector<1x8x8xf32> to vector<1x8xf32>
    %116 = vector.shape_cast %115 : vector<1x8xf32> to vector<1x8x1xf32>
    %117 = tpu.reciprocal %116 {approx = true} : vector<1x8x1xf32> -> vector<1x8x1xf32>
    %118 = vector.broadcast %117 : vector<1x8x1xf32> to vector<1x8x8xf32>
    %119 = arith.mulf %114, %118 : vector<1x8x8xf32>
    %120 = arith.truncf %119 : vector<1x8x8xf32> to vector<1x8x8xbf16>
    "tpu.trace_start"() <{level = 10 : i32, message = "bqk,bkd->bqd"}> : () -> ()
    %cst_33 = arith.constant dense<0.000000e+00> : vector<1x8x8xf32>
    %121 = tpu.matmul %120, %108, %cst_33 {dimension_numbers = #tpu.dot_dimension_numbers<[2], [1], [1], [2], [0, 0, 0, 1, 1, 2], [0], [0]>} : vector<1x8x8xbf16>, vector<1x8x8xbf16>, vector<1x8x8xf32> -> vector<1x8x8xf32>
    "tpu.trace_stop"() : () -> ()
    %122 = vector.shape_cast %121 : vector<1x8x8xf32> to vector<8x8xf32>
    %123 = arith.truncf %122 : vector<8x8xf32> to vector<8x8xbf16>
    %c24 = arith.constant 24 : index
    %c0_34 = arith.constant 0 : index
    %124 = vector.load %arg4[%c24, %c0_34] : memref<32x32xbf16, #tpu.memory_space<vmem>>, vector<8x32xbf16>
    %cst_35 = arith.constant dense<0.000000e+00> : vector<8x32xf32>
    %125 = tpu.matmul %123, %124, %cst_35 {dimension_numbers = #tpu.dot_dimension_numbers<[1], [0], [0], [1], [0, 0, 1, 1], [], []>} : vector<8x8xbf16>, vector<8x32xbf16>, vector<8x32xf32> -> vector<8x32xf32>
    %126 = arith.addf %97, %125 : vector<8x32xf32>
    %127 = arith.addf %1, %126 : vector<8x32xf32>
    %c0_36 = arith.constant 0 : index
    %c0_37 = arith.constant 0 : index
    %128 = vector.load %arg5[%c0_36, %c0_37] : memref<1x32xf32, #tpu.memory_space<vmem>>, vector<1x32xf32>
    %129 = vector.shape_cast %128 : vector<1x32xf32> to vector<32xf32>
    %130 = vector.shape_cast %129 : vector<32xf32> to vector<1x32xf32>
    %131 = vector.broadcast %130 : vector<1x32xf32> to vector<8x32xf32>
    %132 = arith.addf %127, %131 : vector<8x32xf32>
    %c0_38 = arith.constant 0 : index
    %c0_39 = arith.constant 0 : index
    %133 = vector.load %arg6[%c0_38, %c0_39] : memref<1x32xf32, #tpu.memory_space<vmem>>, vector<1x32xf32>
    %134 = vector.shape_cast %133 : vector<1x32xf32> to vector<32xf32>
    %c0_40 = arith.constant 0 : index
    %c0_41 = arith.constant 0 : index
    %135 = vector.load %arg7[%c0_40, %c0_41] : memref<1x32xf32, #tpu.memory_space<vmem>>, vector<1x32xf32>
    %136 = vector.shape_cast %135 : vector<1x32xf32> to vector<32xf32>
    %cst_42 = arith.constant dense<0.000000e+00> : vector<8xf32>
    %137 = vector.multi_reduction <add>, %132, %cst_42 [1] : vector<8x32xf32> to vector<8xf32>
    %138 = vector.shape_cast %137 : vector<8xf32> to vector<8x1xf32>
    %cst_43 = arith.constant 3.200000e+01 : f32
    %139 = vector.broadcast %cst_43 : f32 to vector<8x1xf32>
    %140 = arith.divf %138, %139 : vector<8x1xf32>
    %141 = vector.broadcast %140 : vector<8x1xf32> to vector<8x32xf32>
    %142 = arith.subf %132, %141 : vector<8x32xf32>
    %143 = arith.mulf %142, %142 : vector<8x32xf32>
    %cst_44 = arith.constant dense<0.000000e+00> : vector<8xf32>
    %144 = vector.multi_reduction <add>, %143, %cst_44 [1] : vector<8x32xf32> to vector<8xf32>
    %145 = vector.shape_cast %144 : vector<8xf32> to vector<8x1xf32>
    %cst_45 = arith.constant 3.200000e+01 : f32
    %146 = vector.broadcast %cst_45 : f32 to vector<8x1xf32>
    %147 = arith.divf %145, %146 : vector<8x1xf32>
    %cst_46 = arith.constant 9.99999974E-6 : f32
    %148 = vector.broadcast %cst_46 : f32 to vector<8x1xf32>
    %149 = arith.addf %147, %148 : vector<8x1xf32>
    %150 = math.rsqrt %149 : vector<8x1xf32>
    %151 = vector.broadcast %150 : vector<8x1xf32> to vector<8x32xf32>
    %152 = arith.mulf %142, %151 : vector<8x32xf32>
    %153 = vector.shape_cast %134 : vector<32xf32> to vector<1x32xf32>
    %154 = vector.broadcast %153 : vector<1x32xf32> to vector<8x32xf32>
    %155 = arith.mulf %152, %154 : vector<8x32xf32>
    %156 = vector.shape_cast %136 : vector<32xf32> to vector<1x32xf32>
    %157 = vector.broadcast %156 : vector<1x32xf32> to vector<8x32xf32>
    %158 = arith.addf %155, %157 : vector<8x32xf32>
    %159 = vector.shape_cast %158 : vector<8x32xf32> to vector<1x8x32xf32>
    %c0_47 = arith.constant 0 : index
    %c0_48 = arith.constant 0 : index
    %c0_49 = arith.constant 0 : index
    %160 = vector.load %arg8[%c0_47, %c0_48, %c0_49] : memref<1x8x32xf32, #tpu.memory_space<vmem>>, vector<1x8x32xf32>
    tpu.vector_store %arg8[%c0_47, %c0_48, %c0_49], %159 {strides = array<i32>} : memref<1x8x32xf32, #tpu.memory_space<vmem>>, vector<1x8x32xf32>,
    return
  }
  func.func @transform_0(%arg0: i32) -> (i32, i32, i32) {
    %c0_i32 = arith.constant 0 : i32
    %c0_i32_0 = arith.constant 0 : i32
    %c0_i32_1 = arith.constant 0 : i32
    return %arg0, %c0_i32, %c0_i32_0 : i32, i32, i32
  }
  func.func @transform_1(%arg0: i32) -> (i32, i32) {
    %c0_i32 = arith.constant 0 : i32
    %c0_i32_0 = arith.constant 0 : i32
    %c0_i32_1 = arith.constant 0 : i32
    return %c0_i32, %c0_i32_0 : i32, i32
  }
  func.func @transform_2(%arg0: i32) -> (i32, i32) {
    %c0_i32 = arith.constant 0 : i32
    %c0_i32_0 = arith.constant 0 : i32
    %c0_i32_1 = arith.constant 0 : i32
    return %c0_i32, %c0_i32_0 : i32, i32
  }
  func.func @transform_3(%arg0: i32) -> (i32, i32) {
    %c0_i32 = arith.constant 0 : i32
    %c0_i32_0 = arith.constant 0 : i32
    %c0_i32_1 = arith.constant 0 : i32
    return %c0_i32, %c0_i32_0 : i32, i32
  }
  func.func @transform_4(%arg0: i32) -> (i32, i32) {
    %c0_i32 = arith.constant 0 : i32
    %c0_i32_0 = arith.constant 0 : i32
    %c0_i32_1 = arith.constant 0 : i32
    return %c0_i32, %c0_i32_0 : i32, i32
  }
  func.func @transform_5(%arg0: i32) -> (i32, i32) {
    %c0_i32 = arith.constant 0 : i32
    %c0_i32_0 = arith.constant 0 : i32
    %c0_i32_1 = arith.constant 0 : i32
    return %c0_i32, %c0_i32_0 : i32, i32
  }
  func.func @transform_6(%arg0: i32) -> (i32, i32) {
    %c0_i32 = arith.constant 0 : i32
    %c0_i32_0 = arith.constant 0 : i32
    %c0_i32_1 = arith.constant 0 : i32
    return %c0_i32, %c0_i32_0 : i32, i32
  }
  func.func @transform_7(%arg0: i32) -> (i32, i32, i32) {
    %c0_i32 = arith.constant 0 : i32
    %c0_i32_0 = arith.constant 0 : i32
    %c0_i32_1 = arith.constant 0 : i32
    return %arg0, %c0_i32, %c0_i32_0 : i32, i32, i32
  }
}

</mosaic_0001>

<bundles_post_ra>
// kernel: tpu_custom_call.1
= control target key start
LH: loop header
LB: loop body
LE: loop exit
PB: predicated region body
PF: predicated region fallthrough
CT: control target
= control target key end

     0   :  { %12 = vsyncpa [#allocation3], 0  ;;  %s1981_s0 = inlined_call_operand.hbm [shape: f32[2,8,32], index: 0, kind: input, shape index: {}]   ;;  %s1982_s1 = inlined_call_operand.hbm [shape: bf16[32,96], index: 1, kind: input, shape index: {}]   ;;  %s1983_s2 = inlined_call_operand.vmem [shape: f32[1,96], index: 2, kind: input, shape index: {}]   ;;  %s1984_s3 = inlined_call_operand.hbm [shape: bf16[32,32], index: 3, kind: input, shape index: {}]   ;;  %s1985_s4 = inlined_call_operand.vmem [shape: f32[1,32], index: 4, kind: input, shape index: {}]   ;;  %s1986_s5 = inlined_call_operand.vmem [shape: f32[1,32], index: 5, kind: input, shape index: {}]   ;;  %s1987_s6 = inlined_call_operand.vmem [shape: f32[1,32], index: 6, kind: input, shape index: {}]   ;;  %s1988_s7 = inlined_call_operand.hbm [shape: f32[2,8,32], index: 7, kind: output, shape index: {}]  }
   0x1   :  { %14 = vsyncpa [#allocation3 + $0x1], 0 }
   0x2   :  { %15 = vsyncpa [#allocation6], 0 }
   0x3   :  { %16 = vsyncpa [#allocation4], 0 }
   0x4   :  { %18 = vsyncpa [#allocation4 + $0x1], 0  ;;  %s1636_s24 = smov 0   ;;  %s1638_s25 = smov 0  }
   0x5   :  { %s1640_s26 = smov 0   ;;  %s1642_s27 = smov 0  }
   0x6 LB: > { %s1657_s28 = sadd.s32 4294967295, %s1575_s27   ;;  %s1175_s29 = sadd.s32 4294967294, %s1575_s27   ;;  %s1575_s27 = sphi %s1642_s27, %s2008_s27   ;;  %s1571_s26 = sphi %s1640_s26, %s2007_s26   ;;  %s1567_s25 = sphi %s1638_s25, %s2006_s25   ;;  %s1563_s24 = sphi %s1636_s24, %s2005_s24  }
   0x7   : > { %p44_p0 = scmp.ne.s32.totalorder %s1567_s25, %s1563_s24  ;;  %p1989_p1 = scmp.eq.s32.totalorder %s1657_s28, 0 }
   0x8   : > { %p200_p3 = scmp.eq.s32.totalorder %s1175_s29, 1  ;;  %p1176_p5 = scmp.ge.s32.totalorder %s1575_s27, 1 }
   0x9   : > { %p1666_p4 = por %p1989_p1, %p44_p0  ;;  %p207_p7 = scmp.lt.s32.totalorder %s1575_s27, 3 }
   0xa   : > { %p1671_p6 = por %p200_p3, %p44_p0  ;;  %s1577_s10 = smov [#allocation5]  }
   0xb   : > { %s1992_s30 = scalar_select %p1666_p4, 1, 0 }
   0xc   : > { %s1993_s8 = scalar_select %p1671_p6, 1, 0 }
   0xd   : > { %p1676_p8 = pnand %p1176_p5, %p207_p7  ;;  %s219_s11 = sshll.u32 %s1577_s10, 4  ;;  %s1680_s11 = int_to_ptr.vmem [resolvable:$true] %s219_s11 }
   0xe   : > { %s1578_s13 = smov [#allocation7]   ;;  %s1419_s17 = scalar_lea.hbm %s1982_s1, 256 }
   0xf   : > { %p1329_p9 = pneg %p1676_p8  ;;  %s235_s14 = sshll.u32 %s1578_s13, 4  ;;  %s1691_s14 = int_to_ptr.vmem [resolvable:$true] %s235_s14 }
  0x10   : > { %p1420_p12 = scmp.ne.s32.totalorder %s1982_s1, %s1419_s17  ;;  %p1426_p5 = scmp.lt.u32.totalorder %s1419_s17, %s1982_s1 }
  0x11   : > { %p1687_p11 = pnand %p1329_p9, %p1989_p1 }
  0x13   : > { %p1421_p13 = pneg %p1687_p11 }
  0x15   : > { %p1422_p0 = pnand %p1421_p13, %p1420_p12 }
  0x17   : > { %p1423_p3 = pneg %p1422_p0 }
  0x19   : > { %p1428_p7 = pnand %p1426_p5, %p1423_p3 }
  0x1b   : > { %1431 = shalt.err (!%p1428_p7)
}
  0x1c   : > { %s1432_s22 = scalar_lea.vmem %s1680_s11, 256  ;;  %p1440_p2 = scmp.lt.s32.totalorder %s1680_s11, %s1680_s11 }
  0x1d   : > { %p1433_p9 = scmp.ne.s32.totalorder %s1680_s11, %s1432_s22  ;;  %p1441_p12 = scmp.lt.s32.totalorder %s1432_s22, %s1432_s22 }
  0x1f   : > { %p1435_p10 = pnand %p1433_p9, %p1421_p13  ;;  %p1442_p0 = por %p1441_p12, %p1440_p2 }
  0x21   : > { %p1436_p1 = pneg %p1435_p10 }
  0x23   : > { %p1443_p6 = pnand %p1442_p0, %p1436_p1 }
  0x25   : > { %1446 = shalt.err (!%p1443_p6)
}
  0x26   : > { %s1579_s23 = smov 64   ;;  %s1580_s29 = smov 4  }
  0x27   : > { %1332 = dma.hbm_to_vmem [thread:$0]  (!%p1687_p11), %s1982_s1, 256, %s1680_s11, [#allocation6], %s1579_s23, %s1579_s23, %s1580_s29  }
  0x28   : > { %s1447_s17 = scalar_lea.hbm %s1984_s3, 256 }
  0x29   : > { %p1448_p2 = scmp.ne.s32.totalorder %s1984_s3, %s1447_s17  ;;  %p1454_p10 = scmp.lt.u32.totalorder %s1447_s17, %s1984_s3 }
  0x2b   : > { %p1450_p1 = pnand %p1448_p2, %p1421_p13 }
  0x2d   : > { %p1451_p6 = pneg %p1450_p1 }
  0x2f   : > { %p1456_p3 = pnand %p1454_p10, %p1451_p6 }
  0x31   : > { %1459 = shalt.err (!%p1456_p3)
}
  0x32   : > { %s1460_s11 = scalar_lea.vmem %s1691_s14, 256  ;;  %p1468_p12 = scmp.lt.s32.totalorder %s1691_s14, %s1691_s14 }
  0x33   : > { %p1461_p5 = scmp.ne.s32.totalorder %s1691_s14, %s1460_s11  ;;  %p1469_p0 = scmp.lt.s32.totalorder %s1460_s11, %s1460_s11 }
  0x35   : > { %p1463_p7 = pnand %p1461_p5, %p1421_p13  ;;  %p1470_p2 = por %p1469_p0, %p1468_p12 }
  0x37   : > { %p1464_p9 = pneg %p1463_p7 }
  0x39   : > { %p1471_p1 = pnand %p1470_p2, %p1464_p9 }
  0x3b   : > { %1474 = shalt.err (!%p1471_p1)
}
  0x3c   : > { %1335 = dma.hbm_to_vmem [thread:$0]  (!%p1687_p11), %s1984_s3, 256, %s1691_s14, [#allocation6], %s1579_s23, %s1579_s23, %s1580_s29  }
  0x3d   : > { %s1746_s13 = sadd.s32 1, %s1575_s27   ;;  %s31_s12 = sadd.s32 1, %s1571_s26 }
  0x3e   : > { %s28_s15 = ssub.s32 %s1575_s27, %s1746_s13  ;;  %p38_p13 = scmp.ne.s32.totalorder %s1571_s26, %s1567_s25 }
  0x3f   : > { %p29_p6 = scmp.eq.s32.totalorder %s28_s15, 0  ;;  %p39_p10 = scmp.eq.s32.totalorder %s1575_s27, 0 }
  0x40   : > { %p1996_p3 = scmp.eq.s32.totalorder %s1657_s28, 1  ;;  %p1346_p7 = scmp.lt.s32.totalorder %s1575_s27, 2 }
  0x41   : > { %s1762_s17 = scalar_select %p29_p6, %s1571_s26, %s31_s12  }
  0x42   : > { %p1756_p5 = por %p1996_p3, %p38_p13  ;;  %p40_p9 = por %p39_p10, %p38_p13 }
  0x43   : > { %s258_s18 = sand.u32 1, %s1571_s26   ;;  %s1181_s14 = sshll.u32 %s1575_s27, 7 }
  0x44   : > { %s1997_s16 = scalar_select %p1756_p5, 1, 0 }
  0x45   : > { %s1180_s19 = sshll.u32 %s258_s18, 3  ;;  %s1769_s20 = scalar_lea.hbm %s1981_s0, %s1181_s14 }
  0x46   : > { %s262_s21 = scalar_lea.vmem [#allocation2], %s1180_s19  ;;  %p1773_p11 = pnand %p1346_p7, %p40_p9 }
  0x47   : > { %s269_s11 = sshll.u32 %s262_s21, 4  ;;  %s259_s10 = scalar_lea.sflag [#allocation3], %s258_s18  ;;  %s1771_s11 = int_to_ptr.vmem [resolvable:$true] %s269_s11 }
  0x48   : > { %s1475_s12 = scalar_lea.hbm %s1769_s20, 128  ;;  %p1477_p0 = pneg %p1773_p11 }
  0x49   : > { %p1476_p12 = scmp.ne.s32.totalorder %s1769_s20, %s1475_s12  ;;  %s1480_s14 = scalar_lea.hbm %s1981_s0, 256 }
  0x4a   : > { %p1481_p13 = scmp.lt.u32.totalorder %s1769_s20, %s1981_s0  ;;  %p1482_p6 = scmp.lt.u32.totalorder %s1480_s14, %s1475_s12 }
  0x4b   : > { %p1478_p2 = pnand %p1477_p0, %p1476_p12  ;;  %p1484_p3 = scmp.lt.u32.totalorder %s1475_s12, %s1769_s20 }
  0x4c   : > { %p1483_p10 = por %p1482_p6, %p1481_p13 }
  0x4d   : > { %p1479_p1 = pneg %p1478_p2 }
  0x4e   : > { %p1485_p7 = por %p1484_p3, %p1483_p10 }
  0x50   : > { %p1486_p9 = pnand %p1485_p7, %p1479_p1 }
  0x52   : > { %1489 = shalt.err (!%p1486_p9)
}
  0x53   : > { %s1490_s18 = scalar_lea.vmem %s1771_s11, 128  ;;  %s1581_s21 = smov [#allocation2]  }
  0x54   : > { %p1491_p12 = scmp.ne.s32.totalorder %s1771_s11, %s1490_s18  ;;  %s1495_s15 = sshll.u32 %s1581_s21, 4  ;;  %s1496_s15 = int_to_ptr.vmem [resolvable:$false] %s1495_s15 }
  0x55   : > { %s1497_s19 = scalar_lea.vmem %s1496_s15, 256  ;;  %p1498_p4 = scmp.lt.s32.totalorder %s1771_s11, %s1496_s15 }
  0x56   : > { %p1493_p2 = pnand %p1491_p12, %p1477_p0  ;;  %p1499_p13 = scmp.lt.s32.totalorder %s1497_s19, %s1490_s18 }
  0x58   : > { %p1494_p5 = pneg %p1493_p2  ;;  %p1500_p6 = por %p1499_p13, %p1498_p4 }
  0x5a   : > { %p1501_p10 = pnand %p1500_p6, %p1494_p5 }
  0x5c   : > { %1504 = shalt.err (!%p1501_p10)
}
  0x5d   : > { %1339 = dma.hbm_to_vmem [thread:$0]  (!%p1773_p11), %s1769_s20, 128, %s1771_s11, %s259_s10  }
  0x5e   : > { %278 = sbr.rel (%p1676_p8) target bundleno = 3035 (0xbdb), region = 48  ;;  %s1805_s12 = sand.u32 (!%p1676_p8), 1, %s1567_s25  }
  0x5f   : > { %s1183_s14 = sshll.u32 (!%p1676_p8), %s1805_s12, 3  ;;  %s281_s23 = scalar_lea.sflag (!%p1676_p8), [#allocation3], %s1805_s12 }
  0x60   : > { %s284_s29 = scalar_lea.vmem (!%p1676_p8), [#allocation2], %s1183_s14  ;;  %p1999_p4 = scmp.ne.s32.totalorder (!%p1676_p8), %s1992_s30, 0 }
  0x65   : > { %1550 = dma.done.wait (%p1999_p4), %s281_s23, 128  }
  0x66   : > { %1552 = vsyncadd (%p1999_p4), %s281_s23, 4294967168  ;;  %p2000_p5 = scmp.eq.s32.totalorder %s1657_s28, 0 }
  0x68   : > { %1554 = dma.done.wait (%p2000_p5), [#allocation6], 512   ;;  %p2001_p8 = pmov %p2000_p5 }
  0x69   : > { %v1582_v0 = vmov 0.0   ;;  %vm1583_vm0 = vmmov 0   ;;  %v1399_v1 = vld [vmem:[#allocation5] sm:$0xff]   ;;  %v1400_v2 = vld [vmem:[#allocation5 + $0x8] sm:$0xff]   ;;  %v1825_v3 = vld [vmem:[%s284_s29] sm:$0xff]  ;;  %vm349_vm1 = vcmask 261120  }
  0x6a   : > { %1556 = vsyncadd (%p2001_p8), [#allocation6], 4294966784  ;;  %1237 = vmatprep.subr.bf16.mxu0 %v1582_v0  ;;  %1241 = vmatprep.mubr.msk.bf16.mxu0 %vm1583_vm0, %v1582_v0  ;;  %v325_v4 = vpack.c.bf16 %v1825_v3, %v1825_v3  ;;  %v1187_v5 = vld [vmem:[%s1983_s2] ss:$0 sm:$0xff]  ;;  %s1584_s20 = smov 96   ;;  %s1585_s11 = smov 120  }
  0x6b   : > { %1245 = vmatprep.subr.bf16.mxu1 %v1582_v0  ;;  %1247 = vmatprep.mubr.msk.bf16.mxu1 %vm1583_vm0, %v1582_v0  ;;  %s1586_s22 = smov 88   ;;  %vm399_vm2 = vcmask 64512   ;;  %s1587_s10 = smov 64   ;;  %vm463_vm3 = vcmask 1043456   ;;  %v508_v51 = vld [vmem:[#allocation7] sm:$0xf] }
  0x6c   : > { %1238 = vmatpush3.bf16.msra.mxu0 %v1399_v1  ;;  %s1588_s18 = smov 56   ;;  %s1589_s21 = smov 112   ;;  %v672_v52 = vsel %vm463_vm3, %v508_v51, 0  ;;  %v621_v53 = vld [vmem:[#allocation7 + $0x4] sm:$0xf] }
  0x6d   : > { %1239 = vmatprep.subr.bf16.mxu0 %v1582_v0  ;;  %s1590_s15 = smov 80   ;;  %v626_v54 = vsel %vm463_vm3, %v621_v53, 0  ;;  %s1591_s19 = smov 72   ;;  %v984_v53 = vld [vmem:[#allocation7 + $0xc] sm:$0xf] }
  0x6e   : > { %s1592_s23 = smov 104   ;;  %s1593_s29 = smov 48  }
  0x6f   : > { %s1594_s30 = smov 40   ;;  %s1073_s9 = scalar_lea.sflag [#allocation4], %s1805_s12 }
  0x70   : > { %1240 = vmatpush3.bf16.msra.mxu0 %v1400_v2  ;;  %p2002_p0 = scmp.ne.s32.totalorder %s1997_s16, 0 }
  0x71   : > { %1251 = vmatprep.subr.bf16.mxu0 %v1582_v0 }
  0x73   : > { %1242 = vmatmul.mubr.msk.bf16.vlgmr.msra.gmra.mrb[0].mxu0 %vm349_vm1, %v325_v4 }
  0x74   : > { %1253 = vmatprep.mubr.msk.bf16.mxu0 %vm1583_vm0, %v1582_v0 }
 0x146   : > { %v387_v6 = vpop.f32.mrb[0].mxu0 }
 0x147   : > { %v388_v7 = vadd.f32 %v1187_v5, %v387_v6  ;;  %v1243_v8 = vpop.f32.mrb[1].mxu0 }
 0x148   : > { %v390_v9 = vpop.f32.mrb[2].mxu0 }
 0x149   : > { %v393_v10 = vmul.f32 0.35355338, %v388_v7  ;;  %v1837_v11 = vpack.c.bf16 %v388_v7, %v388_v7  ;;  %v1244_v12 = vpop.f32.mrb[3].mxu0 }
 0x14b   : > { %v1839_v13 = vpack.c.bf16 %v393_v10, %v393_v10  ;;  %397 = vrot.lane.b32.xlu0 %v1837_v11, %s1584_s20 }
 0x14d   : > { %510 = vrot.lane.b32.xlu1 %v1839_v13, %s1585_s11 }
 0x14f   : > { %512 = vrot.lane.b32.xlu0 %v1837_v11, %s1586_s22 }
 0x1bd   : > { %v398_v14 = vpop.permute.xlu0 %397 }
 0x1be   : > { %v404_v15 = vsel %vm399_vm2, %v398_v14, 0 }
 0x1bf   : > { %1246 = vmatpush3.bf16.xpose.msra.mxu1 %v404_v15  ;;  %v511_v18 = vpop.permute.xlu1 %510 }
 0x1c0   : > { %1257 = vmatprep.subr.bf16.mxu1 %v1582_v0 }
 0x1c1   : > { %v513_v16 = vpop.permute.xlu0 %512 }
 0x1c2   : > { %v518_v17 = vsel %vm399_vm2, %v513_v16, 0 }
 0x1c6   : > { %1248 = vmatmul.mubr.msk.bf16.vlgmr.msra.gmra.mrb[0].mxu1 %vm399_vm2, %v1839_v13 }
 0x1c7   : > { %1258 = vmatpush3.bf16.xpose.msra.mxu1 %v518_v17  ;;  %1259 = vmatprep.mubr.msk.bf16.mxu1 %vm1583_vm0, %v1582_v0 }
 0x1c8   : > { %1269 = vmatprep.subr.bf16.mxu1 %v1582_v0 }
 0x1ce   : > { %1260 = vmatmul.mubr.msk.bf16.vlgmr.msra.gmra.mrb[4].mxu1 %vm399_vm2, %v511_v18 }
 0x1cf   : > { %1271 = vmatprep.mubr.msk.bf16.mxu1 %vm1583_vm0, %v1582_v0  ;;  %1270 = vmatpush3.bf16.msra.mxu1 %v626_v54  ;;  %v989_v54 = vsel %vm463_vm3, %v984_v53, 0 }
 0x1d0   : > { %1281 = vmatprep.subr.bf16.mxu1 %v1582_v0 }
 0x299   : > { %v440_v19 = vpop.f32.mrb[0].mxu1 }
 0x29a   : > { %v1249_v20 = vpop.f32.mrb[1].mxu1  ;;  %v446_v21 = vsel %vm399_vm2, %v440_v19, -inf }
 0x29b   : > { %447 = vmax.xlane.f32.xlu1 %v446_v21  ;;  %v443_v22 = vpop.f32.mrb[2].mxu1 }
 0x29c   : > { %v1250_v23 = vpop.f32.mrb[3].mxu1 }
 0x2a1   : > { %v554_v24 = vpop.f32.mrb[4].mxu1 }
 0x2a2   : > { %v1261_v25 = vpop.f32.mrb[5].mxu1  ;;  %v560_v26 = vsel %vm399_vm2, %v554_v24, -inf }
 0x2a3   : > { %561 = vmax.xlane.f32.xlu0 %v560_v26  ;;  %v557_v27 = vpop.f32.mrb[6].mxu1 }
 0x2a4   : > { %v1262_v28 = vpop.f32.mrb[7].mxu1 }
 0x328   : > { %v448_v29 = vpop.xlane.xlu1 %447 }
 0x329   : > { %v449_v30 = vsub.f32 %v440_v19, %v448_v29 }
 0x32b   : > { %v450_v31 = vmul.f32 1.442695, %v449_v30 }
 0x32d   : > { %1401 = vpow2.f32 %v450_v31 }
 0x330   : > { %v562_v32 = vpop.xlane.xlu0 %561 }
 0x331   : > { %v563_v33 = vsub.f32 %v554_v24, %v562_v32 }
 0x333   : > { %v564_v34 = vmul.f32 1.442695, %v563_v33 }
 0x335   : > { %1403 = vpow2.f32 %v564_v34 }
 0x337   : > { %v1402_v35 = vpop.eup %1401 }
 0x338   : > { %v452_v36 = vsel %vm399_vm2, %v1402_v35, 0.0 }
 0x339   : > { %453 = vadd.xlane.f32.xlu0 %v452_v36 }
 0x33f   : > { %v1404_v37 = vpop.eup %1403 }
 0x340   : > { %v566_v38 = vsel %vm399_vm2, %v1404_v37, 0.0 }
 0x341   : > { %567 = vadd.xlane.f32.xlu1 %v566_v38 }
 0x34f   : > { %458 = vrot.lane.b32.xlu0 %v1837_v11, %s1587_s10 }
 0x352   : > { %572 = vrot.lane.b32.xlu1 %v1837_v11, %s1588_s18 }
 0x353   : > { %714 = vrot.lane.b32.xlu0 %v1839_v13, %s1589_s21  ;;  %s1207_s21 = sshll.u32 %s1657_s28, 7  ;;  %s1595_s28 = smov [#allocation8]  }
 0x356   : > { %716 = vrot.lane.b32.xlu1 %v1837_v11, %s1590_s15  ;;  %s322_s15 = scalar_lea.vmem [#allocation8], %s1183_s14  ;;  %s1509_s14 = sshll.u32 %s1595_s28, 4  ;;  %s1510_s14 = int_to_ptr.vmem [resolvable:$false] %s1509_s14 }
 0x357   : > { %s1511_s11 = scalar_lea.vmem %s1510_s14, 256 }
 0x3c6   : > { %v454_v39 = vpop.xlane.xlu0 %453 }
 0x3c7   : > { %1405 = vrcp.f32 %v454_v39 }
 0x3ca   : > { %v459_v40 = vpop.permute.xlu0 %458 }
 0x3cb   : > { %v465_v41 = vsel %vm463_vm3, %v459_v40, 0 }
 0x3cc   : > { %1252 = vmatpush3.bf16.msra.mxu0 %v465_v41 }
 0x3cd   : > { %1263 = vmatprep.subr.bf16.mxu0 %v1582_v0 }
 0x3ce   : > { %v568_v42 = vpop.xlane.xlu1 %567  ;;  %v715_v5 = vpop.permute.xlu0 %714 }
 0x3cf   : > { %1407 = vrcp.f32 %v568_v42 }
 0x3d1   : > { %v1406_v43 = vpop.eup %1405 }
 0x3d2   : > { %v456_v44 = vmul.f32 %v1406_v43, %v1402_v35  ;;  %v573_v45 = vpop.permute.xlu1 %572  ;;  %v825_v35 = vld [vmem:[#allocation7 + $0x8] sm:$0xf] }
 0x3d3   : > { %v578_v47 = vsel %vm463_vm3, %v573_v45, 0  ;;  %v830_v36 = vsel %vm463_vm3, %v825_v35, 0 }
 0x3d4   : > { %v457_v46 = vpack.c.bf16 %v456_v44, %v456_v44 }
 0x3d6   : > { %1254 = vmatmul.mubr.msk.bf16.vlgmr.msra.gmra.mrb[4].mxu0 %vm399_vm2, %v457_v46  ;;  %v717_v60 = vpop.permute.xlu1 %716 }
 0x3d7   : > { %1264 = vmatpush3.bf16.msra.mxu0 %v578_v47  ;;  %1265 = vmatprep.mubr.msk.bf16.mxu0 %vm1583_vm0, %v1582_v0  ;;  %v722_v2 = vsel %vm399_vm2, %v717_v60, 0 }
 0x3d8   : > { %1275 = vmatprep.subr.bf16.mxu0 %v1582_v0 }
 0x3d9   : > { %v1408_v48 = vpop.eup %1407 }
 0x3da   : > { %v570_v49 = vmul.f32 %v1408_v48, %v1404_v37 }
 0x3dc   : > { %v571_v50 = vpack.c.bf16 %v570_v49, %v570_v49 }
 0x3de   : > { %1266 = vmatmul.mubr.msk.bf16.vlgmr.msra.gmra.mrb[8].mxu0 %vm399_vm2, %v571_v50 }
 0x3df   : > { %1277 = vmatprep.mubr.msk.bf16.mxu0 %vm1583_vm0, %v1582_v0  ;;  %1276 = vmatpush3.bf16.msra.mxu0 %v672_v52 }
 0x3e0   : > { %1287 = vmatprep.subr.bf16.mxu0 %v1582_v0 }
 0x4a9   : > { %v501_v55 = vpop.f32.mrb[4].mxu0 }
 0x4aa   : > { %v507_v56 = vpack.c.bf16 %v501_v55, %v501_v55  ;;  %v1255_v57 = vpop.f32.mrb[5].mxu0 }
 0x4ab   : > { %v504_v58 = vpop.f32.mrb[6].mxu0 }
 0x4ac   : > { %v1256_v59 = vpop.f32.mrb[7].mxu0  ;;  %1278 = vmatmul.mubr.msk.bf16.vlgmr.msra.gmra.mrb[12].mxu0 %vm399_vm2, %v507_v56 }
 0x4ad   : > { %1289 = vmatprep.mubr.msk.bf16.mxu0 %vm1583_vm0, %v1582_v0 }
 0x4b1   : > { %v614_v61 = vpop.f32.mrb[8].mxu0 }
 0x4b2   : > { %v620_v62 = vpack.c.bf16 %v614_v61, %v614_v61  ;;  %v1267_v63 = vpop.f32.mrb[9].mxu0 }
 0x4b3   : > { %v617_v1 = vpop.f32.mrb[10].mxu0 }
 0x4b4   : > { %v1268_v4 = vpop.f32.mrb[11].mxu0  ;;  %1272 = vmatmul.mubr.msk.bf16.vlgmr.msra.gmra.mrb[8].mxu1 %vm399_vm2, %v620_v62 }
 0x4b5   : > { %1282 = vmatpush3.bf16.xpose.msra.mxu1 %v722_v2  ;;  %1283 = vmatprep.mubr.msk.bf16.mxu1 %vm1583_vm0, %v1582_v0 }
 0x4b6   : > { %1293 = vmatprep.subr.bf16.mxu1 %v1582_v0 }
 0x4bc   : > { %1284 = vmatmul.mubr.msk.bf16.vlgmr.msra.gmra.mrb[12].mxu1 %vm399_vm2, %v715_v5 }
 0x4bd   : > { %1295 = vmatprep.mubr.msk.bf16.mxu1 %vm1583_vm0, %v1582_v0  ;;  %1294 = vmatpush3.bf16.msra.mxu1 %v830_v36 }
 0x4be   : > { %1305 = vmatprep.subr.bf16.mxu1 %v1582_v0 }
 0x57f   : > { %v708_v6 = vpop.f32.mrb[12].mxu0 }
 0x580   : > { %v1279_v7 = vpop.f32.mrb[13].mxu0 }
 0x581   : > { %v711_v8 = vpop.f32.mrb[14].mxu0 }
 0x582   : > { %v1280_v9 = vpop.f32.mrb[15].mxu0 }
 0x587   : > { %v662_v10 = vpop.f32.mrb[8].mxu1 }
 0x588   : > { %v1888_v12 = vadd.f32 %v708_v6, %v662_v10  ;;  %v1273_v14 = vpop.f32.mrb[9].mxu1  ;;  %v1203_v10 = vld [vmem:[%s1985_s4] ss:$0 sm:$0xff] }
 0x589   : > { %v665_v15 = vpop.f32.mrb[10].mxu1 }
 0x58a   : > { %v1274_v16 = vpop.f32.mrb[11].mxu1 }
 0x58f   : > { %v758_v17 = vpop.f32.mrb[12].mxu1 }
 0x590   : > { %v1285_v18 = vpop.f32.mrb[13].mxu1  ;;  %v764_v19 = vsel %vm399_vm2, %v758_v17, -inf }
 0x591   : > { %765 = vmax.xlane.f32.xlu1 %v764_v19  ;;  %v761_v20 = vpop.f32.mrb[14].mxu1 }
 0x592   : > { %v1286_v21 = vpop.f32.mrb[15].mxu1 }
 0x5a2   : > { %875 = vrot.lane.b32.xlu1 %v1837_v11, %s1591_s19  ;;  %s1086_s19 = sshll.u32 %s322_s15, 4  ;;  %s1938_s19 = int_to_ptr.vmem [resolvable:$true] %s1086_s19 }
 0x5a3   : > { %s1505_s20 = scalar_lea.vmem %s1938_s19, 128  ;;  %p1512_p7 = scmp.lt.s32.totalorder %s1938_s19, %s1510_s14 }
 0x5a4   : > { %p1506_p11 = scmp.ne.s32.totalorder %s1938_s19, %s1505_s20  ;;  %p1513_p9 = scmp.lt.s32.totalorder %s1511_s11, %s1505_s20 }
 0x5a6   : > { %873 = vrot.lane.b32.xlu1 %v1839_v13, %s1592_s23  ;;  %p1507_p1 = pnand %p1506_p11, %p2002_p0  ;;  %p1514_p12 = por %p1513_p9, %p1512_p7 }
 0x5a8   : > { %p1508_p3 = pneg %p1507_p1 }
 0x5aa   : > { %p1515_p2 = pnand %p1514_p12, %p1508_p3 }
 0x61e   : > { %v766_v22 = vpop.xlane.xlu1 %765 }
 0x61f   : > { %v767_v23 = vsub.f32 %v758_v17, %v766_v22 }
 0x621   : > { %v768_v24 = vmul.f32 1.442695, %v767_v23 }
 0x622   : > { %v876_v31 = vpop.permute.xlu1 %875 }
 0x623   : > { %1409 = vpow2.f32 %v768_v24  ;;  %v881_v33 = vsel %vm399_vm2, %v876_v31, 0 }
 0x626   : > { %v874_v34 = vpop.permute.xlu1 %873 }
 0x62d   : > { %v1410_v25 = vpop.eup %1409 }
 0x62e   : > { %v770_v26 = vsel %vm399_vm2, %v1410_v25, 0.0 }
 0x62f   : > { %771 = vadd.xlane.f32.xlu0 %v770_v26 }
 0x645   : > { %776 = vrot.lane.b32.xlu0 %v1837_v11, %s1593_s29 }
 0x6bc   : > { %v772_v27 = vpop.xlane.xlu0 %771 }
 0x6bd   : > { %1411 = vrcp.f32 %v772_v27  ;;  %v1205_v27 = vld [vmem:[%s1987_s6] ss:$0 sm:$0xff] }
 0x6c0   : > { %v777_v28 = vpop.permute.xlu0 %776 }
 0x6c1   : > { %v782_v29 = vsel %vm463_vm3, %v777_v28, 0 }
 0x6c2   : > { %1288 = vmatpush3.bf16.msra.mxu0 %v782_v29 }
 0x6c3   : > { %1299 = vmatprep.subr.bf16.mxu0 %v1582_v0 }
 0x6c7   : > { %v1412_v13 = vpop.eup %1411 }
 0x6c8   : > { %v774_v30 = vmul.f32 %v1412_v13, %v1410_v25  ;;  %v1204_v25 = vld [vmem:[%s1986_s5] ss:$0 sm:$0xff] }
 0x6ca   : > { %v775_v32 = vpack.c.bf16 %v774_v30, %v774_v30 }
 0x6cc   : > { %1290 = vmatmul.mubr.msk.bf16.vlgmr.msra.gmra.mrb[16].mxu0 %vm399_vm2, %v775_v32 }
 0x6cd   : > { %1300 = vmatpush3.bf16.xpose.msra.mxu0 %v881_v33  ;;  %1301 = vmatprep.mubr.msk.bf16.mxu0 %vm1583_vm0, %v1582_v0 }
 0x6ce   : > { %1311 = vmatprep.subr.bf16.mxu0 %v1582_v0 }
 0x6d4   : > { %1302 = vmatmul.mubr.msk.bf16.vlgmr.msra.gmra.mrb[20].mxu0 %vm399_vm2, %v874_v34 }
 0x6d5   : > { %1313 = vmatprep.mubr.msk.bf16.mxu0 %vm1583_vm0, %v1582_v0  ;;  %1312 = vmatpush3.bf16.msra.mxu0 %v989_v54 }
 0x79f   : > { %v818_v37 = vpop.f32.mrb[16].mxu0 }
 0x7a0   : > { %v824_v38 = vpack.c.bf16 %v818_v37, %v818_v37  ;;  %v1291_v39 = vpop.f32.mrb[17].mxu0 }
 0x7a1   : > { %v821_v40 = vpop.f32.mrb[18].mxu0 }
 0x7a2   : > { %v1292_v41 = vpop.f32.mrb[19].mxu0  ;;  %1296 = vmatmul.mubr.msk.bf16.vlgmr.msra.gmra.mrb[16].mxu1 %vm399_vm2, %v824_v38 }
 0x7a3   : > { %1307 = vmatprep.mubr.msk.bf16.mxu1 %vm1583_vm0, %v1582_v0 }
 0x7a7   : > { %v917_v42 = vpop.f32.mrb[20].mxu0 }
 0x7a8   : > { %v1303_v43 = vpop.f32.mrb[21].mxu0  ;;  %v923_v44 = vsel %vm399_vm2, %v917_v42, -inf }
 0x7a9   : > { %924 = vmax.xlane.f32.xlu0 %v923_v44  ;;  %v920_v45 = vpop.f32.mrb[22].mxu0 }
 0x7aa   : > { %v1304_v46 = vpop.f32.mrb[23].mxu0 }
 0x7bf   : > { %935 = vrot.lane.b32.xlu0 %v1837_v11, %s1594_s30  ;;  %s1936_s30 = scalar_lea.hbm %s1988_s7, %s1207_s21 }
 0x836   : > { %v925_v47 = vpop.xlane.xlu0 %924 }
 0x837   : > { %v926_v48 = vsub.f32 %v917_v42, %v925_v47 }
 0x839   : > { %v927_v49 = vmul.f32 1.442695, %v926_v48 }
 0x83a   : > { %v936_v50 = vpop.permute.xlu0 %935 }
 0x83b   : > { %1413 = vpow2.f32 %v927_v49  ;;  %v941_v51 = vsel %vm463_vm3, %v936_v50, 0 }
 0x83c   : > { %1306 = vmatpush3.bf16.msra.mxu1 %v941_v51 }
 0x845   : > { %v1414_v52 = vpop.eup %1413 }
 0x846   : > { %v929_v0 = vsel %vm399_vm2, %v1414_v52, 0.0 }
 0x847   : > { %930 = vadd.xlane.f32.xlu1 %v929_v0 }
 0x875   : > { %v866_v55 = vpop.f32.mrb[16].mxu1 }
 0x876   : > { %v872_v56 = vadd.f32 %v866_v55, %v1888_v12  ;;  %v1297_v11 = vpop.f32.mrb[17].mxu1 }
 0x877   : > { %v869_v57 = vpop.f32.mrb[18].mxu1 }
 0x878   : > { %v1298_v58 = vpop.f32.mrb[19].mxu1 }
 0x8d4   : > { %v931_v59 = vpop.xlane.xlu1 %930 }
 0x8d5   : > { %1415 = vrcp.f32 %v931_v59 }
 0x8df   : > { %v1416_v60 = vpop.eup %1415 }
 0x8e0   : > { %v933_v61 = vmul.f32 %v1416_v60, %v1414_v52 }
 0x8e2   : > { %v934_v62 = vpack.c.bf16 %v933_v61, %v933_v61 }
 0x8e4   : > { %1308 = vmatmul.mubr.msk.bf16.vlgmr.msra.gmra.mrb[20].mxu1 %vm399_vm2, %v934_v62 }
 0x9b7   : > { %v977_v63 = vpop.f32.mrb[20].mxu1 }
 0x9b8   : > { %v983_v1 = vpack.c.bf16 %v977_v63, %v977_v63  ;;  %v1309_v2 = vpop.f32.mrb[21].mxu1 }
 0x9b9   : > { %v980_v4 = vpop.f32.mrb[22].mxu1 }
 0x9ba   : > { %v1310_v5 = vpop.f32.mrb[23].mxu1  ;;  %1314 = vmatmul.mubr.msk.bf16.vlgmr.msra.gmra.mrb[24].mxu0 %vm399_vm2, %v983_v1 }
 0xa8d   : > { %v1025_v6 = vpop.f32.mrb[24].mxu0 }
 0xa8e   : > { %v1031_v7 = vadd.f32 %v1025_v6, %v872_v56  ;;  %v1315_v8 = vpop.f32.mrb[25].mxu0 }
 0xa8f   : > { %v1028_v9 = vpop.f32.mrb[26].mxu0 }
 0xa90   : > { %v1032_v12 = vadd.f32 %v1031_v7, %v1825_v3  ;;  %v1316_v14 = vpop.f32.mrb[27].mxu0 }
 0xa92   : > { %v1040_v15 = vadd.f32 %v1203_v10, %v1032_v12 }
 0xa94   : > { %v1043_v16 = vsel %vm349_vm1, %v1040_v15, 0.0 }
 0xa95   : > { %1044 = vadd.xlane.f32.xlu1 %v1043_v16 }
 0xb22   : > { %v1045_v17 = vpop.xlane.xlu1 %1044 }
 0xb23   : > { %v1047_v18 = vmul.f32 0.03125, %v1045_v17 }
 0xb25   : > { %v1048_v19 = vsub.f32 %v1040_v15, %v1047_v18 }
 0xb27   : > { %v1049_v20 = vmul.f32 %v1048_v19, %v1048_v19 }
 0xb29   : > { %v1050_v21 = vsel %vm349_vm1, %v1049_v20, 0.0 }
 0xb2a   : > { %1051 = vadd.xlane.f32.xlu1 %v1050_v21 }
 0xbb7   : > { %v1052_v22 = vpop.xlane.xlu1 %1051 }
 0xbb8   : > { %v1053_v23 = vmul.f32 0.03125, %v1052_v22 }
 0xbba   : > { %v1054_v24 = vadd.f32 1e-05, %v1053_v23 }
 0xbbc   : > { %1417 = vrsqrt.f32 %v1054_v24 }
 0xbc6   : > { %v1418_v3 = vpop.eup %1417 }
 0xbc7   : > { %v1056_v26 = vmul.f32 %v1418_v3, %v1048_v19 }
 0xbc9   : > { %v1063_v28 = vmul.f32 %v1204_v25, %v1056_v26 }
 0xbcb   : > { %v1070_v29 = vadd.f32 %v1205_v27, %v1063_v28 }
 0xbcd   : > { %1071 = vst.msk [vmem:[%s322_s15] sm:$0xff] %vm349_vm1, %v1070_v29 }
 0xbce   : > { %1518 = shalt.err (!%p1515_p2)
}
 0xbcf   : > { %s1519_s12 = scalar_lea.hbm %s1936_s30, 128  ;;  %s1523_s18 = scalar_lea.hbm %s1988_s7, 256 }
 0xbd0   : > { %p1520_p13 = scmp.ne.s32.totalorder %s1936_s30, %s1519_s12  ;;  %p1524_p4 = scmp.lt.u32.totalorder %s1936_s30, %s1988_s7 }
 0xbd1   : > { %p1525_p5 = scmp.lt.u32.totalorder %s1523_s18, %s1519_s12  ;;  %p1527_p11 = scmp.lt.u32.totalorder %s1519_s12, %s1936_s30 }
 0xbd2   : > { %p1521_p6 = pnand %p1520_p13, %p2002_p0 }
 0xbd3   : > { %p1526_p8 = por %p1525_p5, %p1524_p4 }
 0xbd4   : > { %p1522_p10 = pneg %p1521_p6 }
 0xbd5   : > { %p1528_p1 = por %p1527_p11, %p1526_p8 }
 0xbd7   : > { %p1529_p3 = pnand %p1528_p1, %p1522_p10 }
 0xbd9   : > { %1532 = shalt.err (!%p1529_p3)
}
 0xbda   : > { %1327 = dma.vmem_to_hbm [thread:$0]  (%p2002_p0), %s1938_s19, 128, %s1936_s30, %s1073_s9  }
 0xbdb PF: > { %s1098_s23 = sand.u32 1, %s1563_s24   ;;  %p2003_p7 = scmp.ne.s32.totalorder %s1993_s8, 0 }
 0xbdc   : > { %p2004_p9 = scmp.ge.s32.totalorder %s1575_s27, 2  ;;  %s1099_s29 = scalar_lea.sflag [#allocation4], %s1098_s23 }
 0xbde   : > { %p1341_p12 = pnand %p2004_p9, %p2003_p7 }
 0xbe0   : > { %1558 = dma.done.wait (!%p1341_p12), %s1099_s29, 128  }
 0xbe1   : > { %1560 = vsyncadd (!%p1341_p12), %s1099_s29, 4294967168  ;;  %p21_p2 = scmp.ge.s32.totalorder %s1746_s13, 4   ;;  %s2005_s24 = smov %s1567_s25 }
 0xbe2   : > { %s2006_s25 = smov %s1571_s26  ;;  %s2007_s26 = smov %s1762_s17 }
 0xbe3   : > { %s2008_s27 = smov %s1746_s13  ;;  %23 = sbr.rel (!%p21_p2) target bundleno = 6 (0x6), region = 101 }
 0xbea   :  { %1104 = vsyncpa [#allocation3], 1 }
 0xbeb   :  { %1106 = vsyncpa [#allocation3 + $0x1], 1 }
 0xbec   :  { %1107 = vsyncpa [#allocation6], 1 }
 0xbed   :  { %1108 = vsyncpa [#allocation4], 1 }
 0xbee   :  { %1110 = vsyncpa [#allocation4 + $0x1], 1 }

</bundles_post_ra>
